<compile_context>
chip_gen: v7x
topology: tpu7x:2x2x1
jax: 0.10.0
libtpu: 0.0.40
codegen_flags: <defaults>
</compile_context>

<pallas_src>
import jax
import jax.numpy as jnp
from jax import lax
from jax.experimental import pallas as pl
from jax.experimental.pallas import tpu as pltpu

SMOOTH = 1e-5      # dice smooth
DICE_EPS = 1e-7    # dice eps
ALPHA = 0.1        # focal alpha
GAMMA = 4.5        # focal gamma
FOCAL_EPS = 1e-6   # focal norm clamp

LANES = 128
SUB_ROWS = 64          # inner sub-tile rows: bounds live values to ~8 vregs each (no VMEM spills)
MAX_BLOCK_ROWS = 1024  # (1024,128) f32 = 512 KiB/buffer; x2 inputs x2 buffers = 2 MiB (fits v7x too)
MAX_CHUNKS = 2         # leading "parallel" grid axis (2 TCs on v7x; harmless on 1-TC chips)
PAD_LOGIT = -1e30      # masked (x, t) = (-1e30, 0) contributes exactly 0 to every partial sum


def _cdiv(a, b):
    return -(-a // b)


def _round_up(a, b):
    return _cdiv(a, b) * b


def _row_align(dtype):
    # sublane packing: f32 -> 8 rows, bf16/f16 -> 16, int8/bool -> 32
    return max(8, 32 // jnp.dtype(dtype).itemsize)


def _make_kernel(block_rows, sub_rows, num_sub, steps_per_chunk, total_rows, needs_mask):
    """Kernel accumulating 5 lane-wise partial sums into a (5,8,128) scratch accumulator.

    q=0: sum(p*t)  q=1: sum(p)  q=2: sum(t)  q=3: sum(focal_term)  q=4: sum(focal_elem)
    """

    def kernel(x_ref, t_ref, out_ref, acc_ref):
        s = pl.program_id(1)

        @pl.when(s == 0)
        def _init():
            acc_ref[...] = jnp.zeros_like(acc_ref)

        block_row0 = (pl.program_id(0) * steps_per_chunk + s) * block_rows

        def lane_sum(a):
            # (sub_rows,128) -> (sub_rows//8, 8, 128) -> (8,128): VALU-only tree add
            return a.reshape(-1, 8, LANES).sum(axis=0)

        def body(i, carry):
            s_pt, s_p, s_t, s_ft, s_fe = carry
            r0 = pl.multiple_of(i * sub_rows, sub_rows)
            x = x_ref[pl.ds(r0, sub_rows), :].astype(jnp.float32)
            t = t_ref[pl.ds(r0, sub_rows), :].astype(jnp.float32)
            if needs_mask:
                rows = block_row0 + r0 + lax.broadcasted_iota(jnp.int32, (sub_rows, 1), 0)
                valid = rows < total_rows
                # Select BEFORE any math so garbage from the partial/out-of-range DMA region
                # can never reach a transcendental; (-1e30, 0) makes every term exactly 0.
                x = jnp.where(valid, x, PAD_LOGIT)
                t = jnp.where(valid, t, 0.0)

            # One shared z = exp(-|x|) feeds both the stable BCE-with-logits and the sigmoid.
            z = jnp.exp(-jnp.abs(x))
            # log(1+z) vs log1p(z): z in [0,1]; difference only matters when z < 1e-7 where the
            # focal term is ~z^4.5 anyway -> negligible, and jnp.log is guaranteed to lower.
            logpt = jnp.maximum(x, 0.0) - x * t + jnp.log(1.0 + z)
            den = 1.0 + z
            r = pl.reciprocal(den, approx=True)
            r = r * (2.0 - den * r)                 # one Newton step -> ~f32-accurate 1/(1+z)
            p = jnp.where(x >= 0.0, r, z * r)       # sigmoid(x), exact (no extra exp)

            s_pt = s_pt + lane_sum(p * t)
            s_p = s_p + lane_sum(p)
            s_t = s_t + lane_sum(t)

            # pt = exp(-BCE): exact for binary {0,1} targets (smp focal assumes the same).
            pt = jnp.where(t > 0.5, p, 1.0 - p)
            base = jnp.maximum(1.0 - pt, 0.0)
            b2 = base * base
            focal_term = b2 * b2 * jnp.sqrt(base)   # base ** 4.5 (1 EUP sqrt + 3 VPU muls)
            s_ft = s_ft + lane_sum(focal_term)
            s_fe = s_fe + lane_sum(focal_term * logpt * (0.9 - 0.8 * t))  # folded alpha weight
            return (s_pt, s_p, s_t, s_ft, s_fe)

        zeros = jnp.zeros((8, LANES), jnp.float32)
        sums = lax.fori_loop(0, num_sub, body, (zeros, zeros, zeros, zeros, zeros), unroll=True)

        # One small RMW per quantity per grid step (not per sub-tile).
        for q in range(5):
            acc_ref[q] += sums[q]

        @pl.when(s == pl.num_programs(1) - 1)
        def _finalize():
            out_ref[0] = acc_ref[...]

    return kernel


def _partial_sums_jax(xf, tf):
    """Plain-JAX partial sums for the (rare, <128-element) ragged remainder."""
    xf = xf.astype(jnp.float32)
    tf = tf.astype(jnp.float32)
    p = jax.nn.sigmoid(xf)
    logpt = jnp.maximum(xf, 0.0) - xf * tf + jnp.log1p(jnp.exp(-jnp.abs(xf)))
    pt = jnp.where(tf > 0.5, p, 1.0 - p)
    ft = jnp.maximum(1.0 - pt, 0.0) ** GAMMA
    fe = ft * logpt * (0.9 - 0.8 * tf)
    return jnp.stack([jnp.sum(p * tf), jnp.sum(p), jnp.sum(tf), jnp.sum(ft), jnp.sum(fe)])


def custom_focal_dice_loss(x, y):
    """dice_loss(x, y) + focal_loss(x, y); x = logits, y = binary targets (any layout)."""
    n_elems = x.size
    assert y.size == n_elems, "x and y must have the same number of elements"

    xf = x.reshape(-1)   # native dtype, no wrapper-side cast
    tf = y.reshape(-1)

    n_bulk = (n_elems // LANES) * LANES
    total_rows = n_bulk // LANES

    tail_sums = None
    if n_bulk < n_elems:
        # Tiny (<128 elements) sub-row remainder handled in plain JAX; the bulk prefix slice is
        # the only copy and exists only for non-128-divisible element counts.
        tail_sums = _partial_sums_jax(xf[n_bulk:], tf[n_bulk:])
        xf = xf[:n_bulk]
        tf = tf[:n_bulk]

    if total_rows == 0:
        sums = tail_sums
    else:
        x2 = xf.reshape(total_rows, LANES)   # free reshape: no pad, no dtype copy
        t2 = tf.reshape(total_rows, LANES)

        row_align = max(_row_align(x.dtype), _row_align(y.dtype))
        if total_rows >= SUB_ROWS:
            sub_rows = SUB_ROWS
            block_rows = min(MAX_BLOCK_ROWS, _round_up(total_rows, sub_rows))
        else:
            sub_rows = _round_up(total_rows, row_align)
            block_rows = sub_rows
        num_sub = block_rows // sub_rows

        steps_total = _cdiv(total_rows, block_rows)
        num_chunks = min(MAX_CHUNKS, steps_total)
        steps_per_chunk = _cdiv(steps_total, num_chunks)
        covered_rows = num_chunks * steps_per_chunk * block_rows
        needs_mask = covered_rows > total_rows
        last_block = steps_total - 1

        # Clamp the block index so over-coverage blocks (uneven chunk split / partial last block)
        # never start past the array; the in-kernel row mask zeroes their contribution.
        in_spec = pl.BlockSpec(
            (block_rows, LANES),
            lambda c, s: (jnp.minimum(c * steps_per_chunk + s, last_block), 0),
        )
        out_spec = pl.BlockSpec((1, 5, 8, LANES), lambda c, s: (c, 0, 0, 0))

        kernel = _make_kernel(block_rows, sub_rows, num_sub, steps_per_chunk,
                              total_rows, needs_mask)

        partial = pl.pallas_call(
            kernel,
            out_shape=jax.ShapeDtypeStruct((num_chunks, 5, 8, LANES), jnp.float32),
            grid_spec=pltpu.PrefetchScalarGridSpec(
                num_scalar_prefetch=0,
                grid=(num_chunks, steps_per_chunk),
                in_specs=[in_spec, in_spec],
                out_specs=out_spec,
                scratch_shapes=[pltpu.VMEM((5, 8, LANES), jnp.float32)],
            ),
            compiler_params=pltpu.CompilerParams(
                # NOTE(v7x): use pltpu.CORE_PARALLEL on the chunk axis if the trace shows the
                # grid is not being split across the two TensorCores.
                dimension_semantics=("parallel", "arbitrary"),
            ),
        )(x2, t2)

        sums = jnp.sum(partial, axis=(0, 2, 3))   # (5,) — tiny finalize in plain JAX
        if tail_sums is not None:
            sums = sums + tail_sums

    inter, psum, tsum, fnorm, fnum = sums[0], sums[1], sums[2], sums[3], sums[4]
    card = psum + tsum

    dice_score = (2.0 * inter + SMOOTH) / jnp.maximum(card + SMOOTH, DICE_EPS)
    dice_loss = (1.0 - dice_score) * (tsum > 0.0).astype(jnp.float32)
    focal_loss = (fnum / jnp.maximum(fnorm, FOCAL_EPS)) / float(n_elems)
    return dice_loss + focal_loss


def reference_loss(x, y):
    """Pure-JAX reference mirroring smp DiceLoss + FocalLoss (binary)."""
    xf = x.reshape(-1).astype(jnp.float32)
    tf = y.reshape(-1).astype(jnp.float32)

    p = jax.nn.sigmoid(xf)
    inter = jnp.sum(p * tf)
    card = jnp.sum(p + tf)
    dice_score = (2.0 * inter + SMOOTH) / jnp.maximum(card + SMOOTH, DICE_EPS)
    dice = (1.0 - dice_score) * (jnp.sum(tf) > 0).astype(jnp.float32)

    logpt = jnp.maximum(xf, 0.0) - xf * tf + jnp.log1p(jnp.exp(-jnp.abs(xf)))
    pt = jnp.exp(-logpt)
    focal_term = jnp.maximum(1.0 - pt, 0.0) ** GAMMA
    loss = focal_term * logpt * (ALPHA * tf + (1.0 - ALPHA) * (1.0 - tf))
    loss = loss / jnp.maximum(jnp.sum(focal_term), FOCAL_EPS)
    focal = jnp.mean(loss)
    return dice + focal


if __name__ == "__main__":
    key = jax.random.PRNGKey(0)
    kx, ky = jax.random.split(key)
    # NCHW logits / binary targets (binary mode -> single channel)
    x = jax.random.normal(kx, (2, 1, 32, 32), dtype=jnp.float32)
    y = (jax.random.uniform(ky, (2, 1, 32, 32)) > 0.5).astype(jnp.float32)

    out = custom_focal_dice_loss(x, y)
    out = jax.block_until_ready(out)

    ref = reference_loss(x, y)
    assert jnp.allclose(out, ref, rtol=1e-3, atol=1e-5), (float(out), float(ref))
    print("KERNEL_OK")
</pallas_src>

<mosaic_0001>
module attributes {stable_mosaic.version = 11 : i64} {
  func.func @kernel(%arg0: i32, %arg1: i32, %arg2: memref<16x128xf32, #tpu.memory_space<vmem>>, %arg3: memref<16x128xf32, #tpu.memory_space<vmem>>, %arg4: memref<1x5x8x128xf32, #tpu.memory_space<vmem>>, %arg5: memref<5x8x128xf32, #tpu.memory_space<vmem>>) attributes {dimension_semantics = [#tpu.dimension_semantics<parallel>, #tpu.dimension_semantics<arbitrary>], iteration_bounds = array<i64: 1, 1>, scalar_prefetch = 0 : i64, scratch_operands = 1 : i64, tpu.core_type = #tpu.core_type<tc>, window_params = [{transform_indices = @transform_0, window_bounds = array<i64: 16, 128>}, {transform_indices = @transform_1, window_bounds = array<i64: 16, 128>}, {transform_indices = @transform_2, window_bounds = array<i64: 1, 5, 8, 128>}]} {
    %c0_i32 = arith.constant 0 : i32
    %0 = arith.cmpi eq, %arg1, %c0_i32 : i32
    %1 = arith.extui %0 : i1 to i32
    %c0_i32_0 = arith.constant 0 : i32
    %2 = arith.cmpi ne, %1, %c0_i32_0 : i32
    scf.if %2 {
      %cst_48 = arith.constant 0.000000e+00 : f32
      %101 = vector.broadcast %cst_48 : f32 to vector<5x8x128xf32>
      %c0_49 = arith.constant 0 : index
      %c0_50 = arith.constant 0 : index
      %c0_51 = arith.constant 0 : index
      %102 = vector.load %arg5[%c0_49, %c0_50, %c0_51] : memref<5x8x128xf32, #tpu.memory_space<vmem>>, vector<5x8x128xf32>
      tpu.vector_store %arg5[%c0_49, %c0_50, %c0_51], %101 {strides = array<i32>} : memref<5x8x128xf32, #tpu.memory_space<vmem>>, vector<5x8x128xf32>,
    } else {
    }
    %cst = arith.constant 0.000000e+00 : f32
    %3 = vector.broadcast %cst : f32 to vector<8x128xf32>
    %c0_i32_1 = arith.constant 0 : i32
    %c16_i32 = arith.constant 16 : i32
    %4 = arith.muli %c0_i32_1, %c16_i32 : i32
    %5 = tpu.assume_multiple %4, 16 : i32
    %6 = arith.index_cast %5 : i32 to index
    %c0 = arith.constant 0 : index
    %7 = vector.load %arg2[%6, %c0] : memref<16x128xf32, #tpu.memory_space<vmem>>, vector<16x128xf32>
    %8 = arith.index_cast %5 : i32 to index
    %c0_2 = arith.constant 0 : index
    %9 = vector.load %arg3[%8, %c0_2] : memref<16x128xf32, #tpu.memory_space<vmem>>, vector<16x128xf32>
    %10 = math.absf %7 : vector<16x128xf32>
    %cst_3 = arith.constant 0.000000e+00 : f32
    %11 = vector.broadcast %cst_3 : f32 to vector<16x128xf32>
    %12 = arith.subf %11, %10 : vector<16x128xf32>
    %13 = math.exp %12 : vector<16x128xf32>
    %cst_4 = arith.constant 0.000000e+00 : f32
    %14 = vector.broadcast %cst_4 : f32 to vector<16x128xf32>
    %15 = arith.maximumf %7, %14 : vector<16x128xf32>
    %16 = arith.mulf %7, %9 : vector<16x128xf32>
    %17 = arith.subf %15, %16 : vector<16x128xf32>
    %cst_5 = arith.constant 1.000000e+00 : f32
    %18 = vector.broadcast %cst_5 : f32 to vector<16x128xf32>
    %19 = arith.addf %18, %13 : vector<16x128xf32>
    %20 = math.log %19 : vector<16x128xf32>
    %21 = arith.addf %17, %20 : vector<16x128xf32>
    %cst_6 = arith.constant 1.000000e+00 : f32
    %22 = vector.broadcast %cst_6 : f32 to vector<16x128xf32>
    %23 = arith.addf %22, %13 : vector<16x128xf32>
    %24 = tpu.reciprocal %23 {approx = true} : vector<16x128xf32> -> vector<16x128xf32>
    %25 = arith.mulf %23, %24 : vector<16x128xf32>
    %cst_7 = arith.constant 2.000000e+00 : f32
    %26 = vector.broadcast %cst_7 : f32 to vector<16x128xf32>
    %27 = arith.subf %26, %25 : vector<16x128xf32>
    %28 = arith.mulf %24, %27 : vector<16x128xf32>
    %cst_8 = arith.constant 0.000000e+00 : f32
    %29 = vector.broadcast %cst_8 : f32 to vector<16x128xf32>
    %30 = arith.cmpf oge, %7, %29 : vector<16x128xf32>
    %31 = arith.mulf %13, %28 : vector<16x128xf32>
    %32 = arith.select %30, %28, %31 : vector<16x128xi1>, vector<16x128xf32>
    %33 = arith.mulf %32, %9 : vector<16x128xf32>
    %34 = vector.shape_cast %33 : vector<16x128xf32> to vector<2x8x128xf32>
    %cst_9 = arith.constant dense<0.000000e+00> : vector<8x128xf32>
    %35 = vector.multi_reduction <add>, %34, %cst_9 [0] : vector<2x8x128xf32> to vector<8x128xf32>
    %36 = arith.addf %3, %35 : vector<8x128xf32>
    %37 = vector.shape_cast %32 : vector<16x128xf32> to vector<2x8x128xf32>
    %cst_10 = arith.constant dense<0.000000e+00> : vector<8x128xf32>
    %38 = vector.multi_reduction <add>, %37, %cst_10 [0] : vector<2x8x128xf32> to vector<8x128xf32>
    %39 = arith.addf %3, %38 : vector<8x128xf32>
    %40 = vector.shape_cast %9 : vector<16x128xf32> to vector<2x8x128xf32>
    %cst_11 = arith.constant dense<0.000000e+00> : vector<8x128xf32>
    %41 = vector.multi_reduction <add>, %40, %cst_11 [0] : vector<2x8x128xf32> to vector<8x128xf32>
    %42 = arith.addf %3, %41 : vector<8x128xf32>
    %cst_12 = arith.constant 5.000000e-01 : f32
    %43 = vector.broadcast %cst_12 : f32 to vector<16x128xf32>
    %44 = arith.cmpf ogt, %9, %43 : vector<16x128xf32>
    %cst_13 = arith.constant 1.000000e+00 : f32
    %45 = vector.broadcast %cst_13 : f32 to vector<16x128xf32>
    %46 = arith.subf %45, %32 : vector<16x128xf32>
    %47 = arith.select %44, %32, %46 : vector<16x128xi1>, vector<16x128xf32>
    %cst_14 = arith.constant 1.000000e+00 : f32
    %48 = vector.broadcast %cst_14 : f32 to vector<16x128xf32>
    %49 = arith.subf %48, %47 : vector<16x128xf32>
    %cst_15 = arith.constant 0.000000e+00 : f32
    %50 = vector.broadcast %cst_15 : f32 to vector<16x128xf32>
    %51 = arith.maximumf %49, %50 : vector<16x128xf32>
    %52 = arith.mulf %51, %51 : vector<16x128xf32>
    %53 = arith.mulf %52, %52 : vector<16x128xf32>
    %54 = math.sqrt %51 : vector<16x128xf32>
    %55 = arith.mulf %53, %54 : vector<16x128xf32>
    %56 = vector.shape_cast %55 : vector<16x128xf32> to vector<2x8x128xf32>
    %cst_16 = arith.constant dense<0.000000e+00> : vector<8x128xf32>
    %57 = vector.multi_reduction <add>, %56, %cst_16 [0] : vector<2x8x128xf32> to vector<8x128xf32>
    %58 = arith.addf %3, %57 : vector<8x128xf32>
    %59 = arith.mulf %55, %21 : vector<16x128xf32>
    %cst_17 = arith.constant 8.000000e-01 : f32
    %60 = vector.broadcast %cst_17 : f32 to vector<16x128xf32>
    %61 = arith.mulf %60, %9 : vector<16x128xf32>
    %cst_18 = arith.constant 0.899999976 : f32
    %62 = vector.broadcast %cst_18 : f32 to vector<16x128xf32>
    %63 = arith.subf %62, %61 : vector<16x128xf32>
    %64 = arith.mulf %59, %63 : vector<16x128xf32>
    %65 = vector.shape_cast %64 : vector<16x128xf32> to vector<2x8x128xf32>
    %cst_19 = arith.constant dense<0.000000e+00> : vector<8x128xf32>
    %66 = vector.multi_reduction <add>, %65, %cst_19 [0] : vector<2x8x128xf32> to vector<8x128xf32>
    %67 = arith.addf %3, %66 : vector<8x128xf32>
    %c1_i32 = arith.constant 1 : i32
    %c0_20 = arith.constant 0 : index
    %c0_21 = arith.constant 0 : index
    %c0_22 = arith.constant 0 : index
    %68 = vector.load %arg5[%c0_20, %c0_21, %c0_22] : memref<5x8x128xf32, #tpu.memory_space<vmem>>, vector<1x8x128xf32>
    %69 = vector.shape_cast %68 : vector<1x8x128xf32> to vector<8x128xf32>
    %70 = arith.addf %69, %36 : vector<8x128xf32>
    %c0_23 = arith.constant 0 : index
    %c0_24 = arith.constant 0 : index
    %c0_25 = arith.constant 0 : index
    %71 = vector.load %arg5[%c0_23, %c0_24, %c0_25] : memref<5x8x128xf32, #tpu.memory_space<vmem>>, vector<1x8x128xf32>
    %72 = vector.shape_cast %71 : vector<1x8x128xf32> to vector<8x128xf32>
    %73 = vector.shape_cast %70 : vector<8x128xf32> to vector<1x8x128xf32>
    tpu.vector_store %arg5[%c0_23, %c0_24, %c0_25], %73 {strides = array<i32>} : memref<5x8x128xf32, #tpu.memory_space<vmem>>, vector<1x8x128xf32>,
    %c1 = arith.constant 1 : index
    %c0_26 = arith.constant 0 : index
    %c0_27 = arith.constant 0 : index
    %74 = vector.load %arg5[%c1, %c0_26, %c0_27] : memref<5x8x128xf32, #tpu.memory_space<vmem>>, vector<1x8x128xf32>
    %75 = vector.shape_cast %74 : vector<1x8x128xf32> to vector<8x128xf32>
    %76 = arith.addf %75, %39 : vector<8x128xf32>
    %c1_28 = arith.constant 1 : index
    %c0_29 = arith.constant 0 : index
    %c0_30 = arith.constant 0 : index
    %77 = vector.load %arg5[%c1_28, %c0_29, %c0_30] : memref<5x8x128xf32, #tpu.memory_space<vmem>>, vector<1x8x128xf32>
    %78 = vector.shape_cast %77 : vector<1x8x128xf32> to vector<8x128xf32>
    %79 = vector.shape_cast %76 : vector<8x128xf32> to vector<1x8x128xf32>
    tpu.vector_store %arg5[%c1_28, %c0_29, %c0_30], %79 {strides = array<i32>} : memref<5x8x128xf32, #tpu.memory_space<vmem>>, vector<1x8x128xf32>,
    %c2 = arith.constant 2 : index
    %c0_31 = arith.constant 0 : index
    %c0_32 = arith.constant 0 : index
    %80 = vector.load %arg5[%c2, %c0_31, %c0_32] : memref<5x8x128xf32, #tpu.memory_space<vmem>>, vector<1x8x128xf32>
    %81 = vector.shape_cast %80 : vector<1x8x128xf32> to vector<8x128xf32>
    %82 = arith.addf %81, %42 : vector<8x128xf32>
    %c2_33 = arith.constant 2 : index
    %c0_34 = arith.constant 0 : index
    %c0_35 = arith.constant 0 : index
    %83 = vector.load %arg5[%c2_33, %c0_34, %c0_35] : memref<5x8x128xf32, #tpu.memory_space<vmem>>, vector<1x8x128xf32>
    %84 = vector.shape_cast %83 : vector<1x8x128xf32> to vector<8x128xf32>
    %85 = vector.shape_cast %82 : vector<8x128xf32> to vector<1x8x128xf32>
    tpu.vector_store %arg5[%c2_33, %c0_34, %c0_35], %85 {strides = array<i32>} : memref<5x8x128xf32, #tpu.memory_space<vmem>>, vector<1x8x128xf32>,
    %c3 = arith.constant 3 : index
    %c0_36 = arith.constant 0 : index
    %c0_37 = arith.constant 0 : index
    %86 = vector.load %arg5[%c3, %c0_36, %c0_37] : memref<5x8x128xf32, #tpu.memory_space<vmem>>, vector<1x8x128xf32>
    %87 = vector.shape_cast %86 : vector<1x8x128xf32> to vector<8x128xf32>
    %88 = arith.addf %87, %58 : vector<8x128xf32>
    %c3_38 = arith.constant 3 : index
    %c0_39 = arith.constant 0 : index
    %c0_40 = arith.constant 0 : index
    %89 = vector.load %arg5[%c3_38, %c0_39, %c0_40] : memref<5x8x128xf32, #tpu.memory_space<vmem>>, vector<1x8x128xf32>
    %90 = vector.shape_cast %89 : vector<1x8x128xf32> to vector<8x128xf32>
    %91 = vector.shape_cast %88 : vector<8x128xf32> to vector<1x8x128xf32>
    tpu.vector_store %arg5[%c3_38, %c0_39, %c0_40], %91 {strides = array<i32>} : memref<5x8x128xf32, #tpu.memory_space<vmem>>, vector<1x8x128xf32>,
    %c4 = arith.constant 4 : index
    %c0_41 = arith.constant 0 : index
    %c0_42 = arith.constant 0 : index
    %92 = vector.load %arg5[%c4, %c0_41, %c0_42] : memref<5x8x128xf32, #tpu.memory_space<vmem>>, vector<1x8x128xf32>
    %93 = vector.shape_cast %92 : vector<1x8x128xf32> to vector<8x128xf32>
    %94 = arith.addf %93, %67 : vector<8x128xf32>
    %c4_43 = arith.constant 4 : index
    %c0_44 = arith.constant 0 : index
    %c0_45 = arith.constant 0 : index
    %95 = vector.load %arg5[%c4_43, %c0_44, %c0_45] : memref<5x8x128xf32, #tpu.memory_space<vmem>>, vector<1x8x128xf32>
    %96 = vector.shape_cast %95 : vector<1x8x128xf32> to vector<8x128xf32>
    %97 = vector.shape_cast %94 : vector<8x128xf32> to vector<1x8x128xf32>
    tpu.vector_store %arg5[%c4_43, %c0_44, %c0_45], %97 {strides = array<i32>} : memref<5x8x128xf32, #tpu.memory_space<vmem>>, vector<1x8x128xf32>,
    %c0_i32_46 = arith.constant 0 : i32
    %98 = arith.cmpi eq, %arg1, %c0_i32_46 : i32
    %99 = arith.extui %98 : i1 to i32
    %c0_i32_47 = arith.constant 0 : i32
    %100 = arith.cmpi ne, %99, %c0_i32_47 : i32
    scf.if %100 {
      %c0_48 = arith.constant 0 : index
      %c0_49 = arith.constant 0 : index
      %c0_50 = arith.constant 0 : index
      %101 = vector.load %arg5[%c0_48, %c0_49, %c0_50] : memref<5x8x128xf32, #tpu.memory_space<vmem>>, vector<5x8x128xf32>
      %c0_51 = arith.constant 0 : index
      %c0_52 = arith.constant 0 : index
      %c0_53 = arith.constant 0 : index
      %c0_54 = arith.constant 0 : index
      %102 = vector.load %arg4[%c0_51, %c0_52, %c0_53, %c0_54] : memref<1x5x8x128xf32, #tpu.memory_space<vmem>>, vector<1x5x8x128xf32>
      %103 = vector.shape_cast %102 : vector<1x5x8x128xf32> to vector<5x8x128xf32>
      %104 = vector.shape_cast %101 : vector<5x8x128xf32> to vector<1x5x8x128xf32>
      tpu.vector_store %arg4[%c0_51, %c0_52, %c0_53, %c0_54], %104 {strides = array<i32>} : memref<1x5x8x128xf32, #tpu.memory_space<vmem>>, vector<1x5x8x128xf32>,
    } else {
    }
    return
  }
  func.func @transform_0(%arg0: i32, %arg1: i32) -> (i32, i32) {
    %c1_i32 = arith.constant 1 : i32
    %0 = arith.muli %arg0, %c1_i32 : i32
    %1 = arith.addi %0, %arg1 : i32
    %c0_i32 = arith.constant 0 : i32
    %2 = arith.minsi %1, %c0_i32 : i32
    %c0_i32_0 = arith.constant 0 : i32
    %c0_i32_1 = arith.constant 0 : i32
    return %2, %c0_i32_0 : i32, i32
  }
  func.func @transform_1(%arg0: i32, %arg1: i32) -> (i32, i32) {
    %c1_i32 = arith.constant 1 : i32
    %0 = arith.muli %arg0, %c1_i32 : i32
    %1 = arith.addi %0, %arg1 : i32
    %c0_i32 = arith.constant 0 : i32
    %2 = arith.minsi %1, %c0_i32 : i32
    %c0_i32_0 = arith.constant 0 : i32
    %c0_i32_1 = arith.constant 0 : i32
    return %2, %c0_i32_0 : i32, i32
  }
  func.func @transform_2(%arg0: i32, %arg1: i32) -> (i32, i32, i32, i32) {
    %c0_i32 = arith.constant 0 : i32
    %c0_i32_0 = arith.constant 0 : i32
    %c0_i32_1 = arith.constant 0 : i32
    %c0_i32_2 = arith.constant 0 : i32
    return %arg0, %c0_i32, %c0_i32_0, %c0_i32_1 : i32, i32, i32, i32
  }
}

</mosaic_0001>

<bundles_post_ra>
// kernel: tpu_custom_call.1
= control target key start
LH: loop header
LB: loop body
LE: loop exit
PB: predicated region body
PF: predicated region fallthrough
CT: control target
= control target key end

     0   :  { %7 = vsyncpa [#allocation4], 0  ;;  %s390_s0 = inlined_call_operand.hbm [shape: f32[16,128], index: 0, kind: input, shape index: {}]   ;;  %s391_s1 = inlined_call_operand.hbm [shape: f32[16,128], index: 1, kind: input, shape index: {}]   ;;  %s392_s2 = inlined_call_operand.hbm [shape: f32[1,5,8,128], index: 2, kind: output, shape index: {}]  }
   0x1   :  { %8 = vsyncpa [#allocation7], 0 }
   0x2   :  { %9 = vsyncpa [#allocation5], 0  ;;  %s306_s9 = smov [#allocation3]   ;;  %s234_s13 = scalar_lea.hbm %s390_s0, 256 }
   0x3   :  { %s21_s10 = sshll.u32 %s306_s9, 4  ;;  %p235_p0 = scmp.ne.s32.totalorder %s390_s0, %s234_s13  ;;  %s22_s10 = int_to_ptr.vmem [resolvable:$true] %s21_s10 }
   0x4   :  { %p238_p1 = scmp.lt.u32.totalorder %s234_s13, %s390_s0 }
   0x6   :  { %p240_p2 = pnand %p238_p1, %p235_p0 }
   0x8   :  { %243 = shalt.err (!%p240_p2)
}
   0x9   :  { %s244_s18 = scalar_lea.vmem %s22_s10, 256  ;;  %p249_p4 = scmp.lt.s32.totalorder %s22_s10, %s22_s10 }
   0xa   :  { %p245_p3 = scmp.ne.s32.totalorder %s22_s10, %s244_s18  ;;  %p250_p5 = scmp.lt.s32.totalorder %s244_s18, %s244_s18 }
   0xc   :  { %p251_p6 = por %p250_p5, %p249_p4 }
   0xe   :  { %p252_p7 = pnand %p251_p6, %p245_p3 }
  0x10   :  { %255 = shalt.err (!%p252_p7)
}
  0x11   :  { %s307_s19 = smov 128   ;;  %s308_s20 = smov 8  }
  0x12   :  { %27 = dma.hbm_to_vmem [thread:$0]  %s390_s0, 256, %s22_s10, [#allocation4], %s307_s19, %s307_s19, %s308_s20  }
  0x13   :  { %s309_s23 = smov [#allocation6]   ;;  %s256_s27 = scalar_lea.hbm %s391_s1, 256 }
  0x14   :  { %s39_s24 = sshll.u32 %s309_s23, 4  ;;  %p257_p8 = scmp.ne.s32.totalorder %s391_s1, %s256_s27  ;;  %s40_s24 = int_to_ptr.vmem [resolvable:$true] %s39_s24 }
  0x15   :  { %p260_p9 = scmp.lt.u32.totalorder %s256_s27, %s391_s1 }
  0x17   :  { %p262_p10 = pnand %p260_p9, %p257_p8 }
  0x19   :  { %265 = shalt.err (!%p262_p10)
}
  0x1a   :  { %s266_s4 = scalar_lea.vmem %s40_s24, 256  ;;  %p271_p12 = scmp.lt.s32.totalorder %s40_s24, %s40_s24 }
  0x1b   :  { %p267_p11 = scmp.ne.s32.totalorder %s40_s24, %s266_s4  ;;  %p272_p13 = scmp.lt.s32.totalorder %s266_s4, %s266_s4 }
  0x1d   :  { %p273_p0 = por %p272_p13, %p271_p12 }
  0x1f   :  { %p274_p1 = pnand %p273_p0, %p267_p11 }
  0x21   :  { %277 = shalt.err (!%p274_p1)
}
  0x22   :  { %45 = dma.hbm_to_vmem [thread:$0]  %s391_s1, 256, %s40_s24, [#allocation7], %s307_s19, %s307_s19, %s308_s20  }
  0x23   :  { %300 = dma.done.wait [#allocation4], 256  }
  0x24   :  { %301 = vsyncadd [#allocation4], 4294967040 }
  0x25   :  { %302 = dma.done.wait [#allocation7], 256  }
  0x26   :  { %303 = vsyncadd [#allocation7], 4294967040  ;;  %v356_v0 = vld [vmem:[#allocation3] sm:$0xff]  ;;  %v358_v1 = vld [vmem:[#allocation3 + $0x8] sm:$0xff]  ;;  %s310_s1 = smov [#allocation8]  }
  0x27   :  { %v71_v2 = vld [vmem:[#allocation6] sm:$0xff]  ;;  %v360_v3 = vld [vmem:[#allocation6 + $0x8] sm:$0xff]  ;;  %v73_v4 = vand.u32 2147483647, %v356_v0  ;;  %v74_v5 = vand.u32 2147483647, %v358_v1 }
  0x28   :  { %v115_v6 = vadd.f32 %v360_v3, %v71_v2  ;;  %vm103_vm0 = vcmp.ge.f32.partialorder %v356_v0, 0.0  ;;  %vm104_vm1 = vcmp.ge.f32.partialorder %v358_v1, 0.0  ;;  %vm117_vm2 = vcmp.gt.f32.partialorder %v71_v2, 0.5  ;;  %s196_s6 = sshll.u32 %s310_s1, 4  ;;  %s197_s6 = int_to_ptr.vmem [resolvable:$true] %s196_s6 }
  0x29   :  { %v75_v7 = vsub.f32 0.0, %v73_v4  ;;  %v76_v8 = vsub.f32 0.0, %v74_v5  ;;  %vm118_vm3 = vcmp.gt.f32.partialorder %v360_v3, 0.5  ;;  %v81_v39 = vmax.f32 %v356_v0, 0.0  ;;  %s278_s7 = scalar_lea.vmem %s197_s6, 640  ;;  %p283_p3 = scmp.lt.s32.totalorder %s197_s6, %s197_s6 }
  0x2a   :  { %188 = vst [vmem:[#allocation8 + $0x10] sm:$0xff] %v115_v6  ;;  %v82_v40 = vmax.f32 %v358_v1, 0.0  ;;  %v83_v41 = vmul.f32 %v71_v2, %v356_v0  ;;  %v84_v42 = vmul.f32 %v360_v3, %v358_v1  ;;  %v151_v50 = vmul.f32 0.8, %v71_v2  ;;  %p279_p2 = scmp.ne.s32.totalorder %s197_s6, %s278_s7  ;;  %p284_p4 = scmp.lt.s32.totalorder %s278_s7, %s278_s7 }
  0x2b   :  { %v77_v9 = vmul.f32 1.442695, %v75_v7  ;;  %v79_v10 = vmul.f32 1.442695, %v76_v8  ;;  %v152_v60 = vmul.f32 0.8, %v360_v3 }
  0x2c   :  { %v85_v47 = vsub.f32 %v81_v39, %v83_v41  ;;  %v86_v48 = vsub.f32 %v82_v40, %v84_v42  ;;  %v153_v5 = vsub.f32 0.9, %v151_v50  ;;  %p285_p5 = por %p284_p4, %p283_p3 }
  0x2d   :  { %218 = vpow2.f32 %v77_v9  ;;  %v154_v7 = vsub.f32 0.9, %v152_v60 }
  0x2e   :  { %220 = vpow2.f32 %v79_v10  ;;  %p286_p6 = pnand %p285_p5, %p279_p2 }
  0x37   :  { %v219_v11 = vpop.eup %218 }
  0x38   :  { %v221_v12 = vpop.eup %220  ;;  %v87_v13 = vadd.f32 1.0, %v219_v11 }
  0x39   :  { %v88_v14 = vadd.f32 1.0, %v221_v12 }
  0x3a   :  { %222 = vrcp.f32 %v87_v13 }
  0x3b   :  { %224 = vrcp.f32 %v88_v14 }
  0x3c   :  { %226 = vlog2.f32 %v87_v13 }
  0x3d   :  { %228 = vlog2.f32 %v88_v14 }
  0x44   :  { %v223_v15 = vpop.eup %222 }
  0x45   :  { %v225_v16 = vpop.eup %224  ;;  %v97_v17 = vmul.f32 %v223_v15, %v87_v13 }
  0x46   :  { %v98_v18 = vmul.f32 %v225_v16, %v88_v14  ;;  %v227_v43 = vpop.eup %226 }
  0x47   :  { %v99_v19 = vsub.f32 2.0, %v97_v17  ;;  %v229_v44 = vpop.eup %228  ;;  %v90_v49 = vmul.f32 0.6931472, %v227_v43 }
  0x48   :  { %v100_v20 = vsub.f32 2.0, %v98_v18  ;;  %v92_v53 = vmul.f32 0.6931472, %v229_v44 }
  0x49   :  { %v101_v21 = vmul.f32 %v223_v15, %v99_v19  ;;  %v93_v62 = vadd.f32 %v90_v49, %v85_v47 }
  0x4a   :  { %v102_v22 = vmul.f32 %v225_v16, %v100_v20  ;;  %v94_v1 = vadd.f32 %v92_v53, %v86_v48 }
  0x4b   :  { %v105_v23 = vmul.f32 %v219_v11, %v101_v21 }
  0x4c   :  { %v106_v24 = vmul.f32 %v221_v12, %v102_v22 }
  0x4d   :  { %v107_v25 = vsel %vm103_vm0, %v101_v21, %v105_v23 }
  0x4e   :  { %v108_v26 = vsel %vm104_vm1, %v102_v22, %v106_v24  ;;  %v109_v27 = vmul.f32 %v107_v25, %v71_v2  ;;  %v119_v28 = vsub.f32 1.0, %v107_v25 }
  0x4f   :  { %v110_v29 = vmul.f32 %v108_v26, %v360_v3  ;;  %v120_v30 = vsub.f32 1.0, %v108_v26  ;;  %v113_v31 = vadd.f32 %v108_v26, %v107_v25 }
  0x50   :  { %v121_v32 = vsel %vm117_vm2, %v107_v25, %v119_v28 }
  0x51   :  { %v111_v33 = vadd.f32 %v110_v29, %v109_v27  ;;  %v122_v34 = vsel %vm118_vm3, %v108_v26, %v120_v30  ;;  %v123_v35 = vsub.f32 1.0, %v121_v32  ;;  %187 = vst [vmem:[#allocation8 + $0x8] sm:$0xff] %v113_v31 }
  0x52   :  { %v124_v36 = vsub.f32 1.0, %v122_v34 }
  0x53   :  { %v125_v37 = vmax.f32 %v123_v35, 0.0  ;;  %186 = vst [vmem:[#allocation8] sm:$0xff] %v111_v33 }
  0x54   :  { %v126_v38 = vmax.f32 %v124_v36, 0.0 }
  0x55   :  { %230 = vrsqrt.f32 %v125_v37  ;;  %v127_v45 = vmul.f32 %v125_v37, %v125_v37  ;;  %vm133_vm4 = vcmp.eq.f32.partialorder %v125_v37, inf  ;;  %vm135_vm5 = vcmp.eq.f32.partialorder %v125_v37, 0.0 }
  0x56   :  { %232 = vrsqrt.f32 %v126_v38  ;;  %v128_v46 = vmul.f32 %v126_v38, %v126_v38  ;;  %v136_v52 = vand.u32 2147483648, %v125_v37  ;;  %vm140_vm6 = vcmp.eq.f32.partialorder %v126_v38, inf }
  0x57   :  { %v129_v55 = vmul.f32 %v127_v45, %v127_v45  ;;  %v143_v57 = vand.u32 2147483648, %v126_v38  ;;  %vm142_vm7 = vcmp.eq.f32.partialorder %v126_v38, 0.0 }
  0x58   :  { %v130_v58 = vmul.f32 %v128_v46, %v128_v46 }
  0x5f   :  { %v231_v51 = vpop.eup %230 }
  0x60   :  { %v233_v54 = vpop.eup %232  ;;  %v132_v56 = vmul.f32 %v231_v51, %v125_v37 }
  0x61   :  { %v139_v59 = vmul.f32 %v233_v54, %v126_v38 }
  0x62   :  { %v134_v61 = vsel %vm133_vm4, %v125_v37, %v132_v56 }
  0x63   :  { %v137_v63 = vsel %vm135_vm5, %v136_v52, %v134_v61  ;;  %v141_v0 = vsel %vm140_vm6, %v126_v38, %v139_v59 }
  0x64   :  { %v144_v2 = vsel %vm142_vm7, %v143_v57, %v141_v0  ;;  %v145_v4 = vmul.f32 %v137_v63, %v129_v55 }
  0x65   :  { %v146_v6 = vmul.f32 %v144_v2, %v130_v58 }
  0x66   :  { %v149_v8 = vmul.f32 %v145_v4, %v93_v62 }
  0x67   :  { %v147_v9 = vadd.f32 %v146_v6, %v145_v4  ;;  %v150_v10 = vmul.f32 %v146_v6, %v94_v1 }
  0x68   :  { %v155_v11 = vmul.f32 %v153_v5, %v149_v8 }
  0x69   :  { %189 = vst [vmem:[#allocation8 + $0x18] sm:$0xff] %v147_v9  ;;  %v156_v12 = vmul.f32 %v154_v7, %v150_v10 }
  0x6b   :  { %v157_v13 = vadd.f32 %v156_v12, %v155_v11 }
  0x6d   :  { %190 = vst [vmem:[#allocation8 + $0x20] sm:$0xff] %v157_v13 }
  0x6e   :  { %289 = shalt.err (!%p286_p6)
}
  0x6f   :  { %s290_s10 = scalar_lea.hbm %s392_s2, 640 }
  0x70   :  { %p291_p7 = scmp.ne.s32.totalorder %s392_s2, %s290_s10  ;;  %p294_p8 = scmp.lt.u32.totalorder %s290_s10, %s392_s2 }
  0x72   :  { %p296_p9 = pnand %p294_p8, %p291_p7 }
  0x74   :  { %299 = shalt.err (!%p296_p9)
}
  0x75   :  { %202 = dma.vmem_to_hbm [thread:$0]  %s197_s6, 640, %s392_s2, [#allocation5], %s307_s19, %s307_s19, %s308_s20  }
  0x76   :  { %304 = dma.done.wait [#allocation5], 640  }
  0x77   :  { %305 = vsyncadd [#allocation5], 4294966656 }
  0x78   :  { %206 = vsyncpa [#allocation4], 1 }
  0x79   :  { %207 = vsyncpa [#allocation7], 1 }
  0x7a   :  { %208 = vsyncpa [#allocation5], 1 }

</bundles_post_ra>
